<compile_context>
chip_gen: v5e
topology: v5e:2x2
jax: 0.10.0
libtpu: 0.0.40
codegen_flags: <defaults>
</compile_context>

<pallas_src>
import math

import jax
import jax.numpy as jnp
from jax.experimental import pallas as pl
from jax.experimental.pallas import tpu as pltpu


def _round_up(n, m):
    return ((n + m - 1) // m) * m


def _where_kernel(cond_ref, x_ref, y_ref, out_ref):
    # cond_ref: (1 or TR, TC) int8   -- 0/1 mask, row dim may broadcast
    # x_ref   : (1 or TR, TC)        -- row dim may broadcast
    # y_ref   : (1 or TR, TC)        -- row dim may broadcast
    # out_ref : (TR, TC)             -- promoted dtype
    res = jnp.where(cond_ref[...] != 0, x_ref[...], y_ref[...])
    if res.shape != out_ref.shape:  # trace-time only; degenerate all-broadcast case
        res = jnp.broadcast_to(res, out_ref.shape)
    out_ref[...] = res.astype(out_ref.dtype)


def _prep_2d(a, out_shape):
    """Rank-align to out_shape, broadcast every axis except the leading one,
    flatten to 2D (lead, prod(rest)).  Leading axis stays 1 when it
    broadcasts so the BlockSpec can keep that tile resident across rows."""
    a = jnp.asarray(a)
    a = a.reshape((1,) * (len(out_shape) - a.ndim) + a.shape)
    lead = a.shape[0]
    a = jnp.broadcast_to(a, (lead,) + tuple(out_shape[1:]))
    return a.reshape(lead, -1)


def _pad_2d(a, rows_to, cols_to):
    r, c = a.shape
    if r == rows_to and c == cols_to:
        return a
    return jnp.pad(a, ((0, rows_to - r), (0, cols_to - c)))


def where_pallas(cond, x, y, *, max_row_block=256, max_col_block=2048):
    """torch.where(cond, x, y) with NumPy broadcasting as a tiled Pallas kernel."""
    out_shape = jnp.broadcast_shapes(jnp.shape(cond), jnp.shape(x), jnp.shape(y))
    out_dtype = jnp.result_type(x, y)

    rows = out_shape[0] if len(out_shape) >= 1 else 1
    cols = int(math.prod(out_shape[1:])) if len(out_shape) >= 2 else 1

    # Lane-dense column tiling (multiple of 128), row tiling (multiple of 8).
    col_block = min(max_col_block, _round_up(cols, 128))
    cols_p = _round_up(cols, col_block)
    row_block = min(max_row_block, _round_up(rows, 8))
    rows_p = _round_up(rows, row_block)

    def _prep_operand(a):
        a2 = _prep_2d(a, out_shape)
        lead = a2.shape[0]
        if lead == rows:
            a2 = _pad_2d(a2, rows_p, cols_p)
            spec = pl.BlockSpec((row_block, col_block), lambda j, i: (i, j))
        else:  # lead == 1 and rows > 1: broadcast over rows.
            # Block index pinned to 0 along rows; rows is the *inner* grid
            # axis, so this tile is fetched once per column strip and stays
            # resident in VMEM while the row blocks iterate.
            a2 = _pad_2d(a2, 1, cols_p)
            spec = pl.BlockSpec((1, col_block), lambda j, i: (0, j))
        return a2, spec

    cond_2d, cond_spec = _prep_operand(jnp.asarray(cond).astype(jnp.int8))
    x_2d, x_spec = _prep_operand(x)
    y_2d, y_spec = _prep_operand(y)

    grid = (cols_p // col_block, rows_p // row_block)  # (outer=cols, inner=rows)

    out_padded = pl.pallas_call(
        _where_kernel,
        out_shape=jax.ShapeDtypeStruct((rows_p, cols_p), out_dtype),
        grid=grid,
        in_specs=[cond_spec, x_spec, y_spec],
        out_specs=pl.BlockSpec((row_block, col_block), lambda j, i: (i, j)),
        compiler_params=pltpu.CompilerParams(
            dimension_semantics=("parallel", "parallel"),
        ),
    )(cond_2d, x_2d, y_2d)

    return out_padded[:rows, :cols].reshape(out_shape)


if __name__ == "__main__":
    key = jax.random.PRNGKey(0)
    k_c, k_x, k_y = jax.random.split(key, 3)

    # Rank-3, small shapes, with leading-dim broadcast (the "_bc" case).
    B, C, L = 2, 4, 8
    cond = jax.random.uniform(k_c, (1, C, L)) > 0.5           # bool, broadcasts over B
    x = jax.random.normal(k_x, (B, C, L), dtype=jnp.float32)
    y = jax.random.normal(k_y, (1, C, L), dtype=jnp.float32)  # broadcasts over B

    out = where_pallas(cond, x, y)
    out = jax.block_until_ready(out)

    # Reference check against plain JAX (same semantics as torch.where).
    ref = jnp.where(cond, x, y)
    assert out.shape == ref.shape and out.dtype == ref.dtype
    assert bool(jnp.all(out == ref))

    print("KERNEL_OK")
</pallas_src>

<mosaic_0001>
module attributes {stable_mosaic.version = 11 : i64} {
  func.func @_where_kernel(%arg0: i32, %arg1: i32, %arg2: memref<1x128xi8, #tpu.memory_space<vmem>>, %arg3: memref<8x128xf32, #tpu.memory_space<vmem>>, %arg4: memref<1x128xf32, #tpu.memory_space<vmem>>, %arg5: memref<8x128xf32, #tpu.memory_space<vmem>>) attributes {dimension_semantics = [#tpu.dimension_semantics<parallel>, #tpu.dimension_semantics<parallel>], iteration_bounds = array<i64: 1, 1>, scalar_prefetch = 0 : i64, scratch_operands = 0 : i64, tpu.core_type = #tpu.core_type<tc>, window_params = [{transform_indices = @transform_0, window_bounds = array<i64: 1, 128>}, {transform_indices = @transform_1, window_bounds = array<i64: 8, 128>}, {transform_indices = @transform_2, window_bounds = array<i64: 1, 128>}, {transform_indices = @transform_3, window_bounds = array<i64: 8, 128>}]} {
    %c0 = arith.constant 0 : index
    %c0_0 = arith.constant 0 : index
    %0 = vector.load %arg2[%c0, %c0_0] : memref<1x128xi8, #tpu.memory_space<vmem>>, vector<1x128xi8>
    %c0_i8 = arith.constant 0 : i8
    %1 = vector.broadcast %c0_i8 : i8 to vector<1x128xi8>
    %2 = arith.cmpi ne, %0, %1 : vector<1x128xi8>
    %c0_1 = arith.constant 0 : index
    %c0_2 = arith.constant 0 : index
    %3 = vector.load %arg3[%c0_1, %c0_2] : memref<8x128xf32, #tpu.memory_space<vmem>>, vector<8x128xf32>
    %c0_3 = arith.constant 0 : index
    %c0_4 = arith.constant 0 : index
    %4 = vector.load %arg4[%c0_3, %c0_4] : memref<1x128xf32, #tpu.memory_space<vmem>>, vector<1x128xf32>
    %5 = vector.shape_cast %2 : vector<1x128xi1> to vector<1x128xi1>
    %6 = vector.broadcast %5 : vector<1x128xi1> to vector<8x128xi1>
    %7 = vector.shape_cast %4 : vector<1x128xf32> to vector<1x128xf32>
    %8 = vector.broadcast %7 : vector<1x128xf32> to vector<8x128xf32>
    %9 = arith.select %6, %3, %8 : vector<8x128xi1>, vector<8x128xf32>
    %c0_5 = arith.constant 0 : index
    %c0_6 = arith.constant 0 : index
    %10 = vector.load %arg5[%c0_5, %c0_6] : memref<8x128xf32, #tpu.memory_space<vmem>>, vector<8x128xf32>
    tpu.vector_store %arg5[%c0_5, %c0_6], %9 {strides = array<i32>} : memref<8x128xf32, #tpu.memory_space<vmem>>, vector<8x128xf32>,
    return
  }
  func.func @transform_0(%arg0: i32, %arg1: i32) -> (i32, i32) {
    %c0_i32 = arith.constant 0 : i32
    %c0_i32_0 = arith.constant 0 : i32
    return %c0_i32, %arg0 : i32, i32
  }
  func.func @transform_1(%arg0: i32, %arg1: i32) -> (i32, i32) {
    %c0_i32 = arith.constant 0 : i32
    return %arg1, %arg0 : i32, i32
  }
  func.func @transform_2(%arg0: i32, %arg1: i32) -> (i32, i32) {
    %c0_i32 = arith.constant 0 : i32
    %c0_i32_0 = arith.constant 0 : i32
    return %c0_i32, %arg0 : i32, i32
  }
  func.func @transform_3(%arg0: i32, %arg1: i32) -> (i32, i32) {
    %c0_i32 = arith.constant 0 : i32
    return %arg1, %arg0 : i32, i32
  }
}

</mosaic_0001>

<bundles_post_ra>
// kernel: tpu_custom_call.1
= control target key start
LH: loop header
LB: loop body
LE: loop exit
PB: predicated region body
PF: predicated region fallthrough
CT: control target
= control target key end

     0   :  { %8 = vsyncpa [#allocation3], 0  ;;  %s197_s0 = inlined_call_operand.hbm [shape: s8[1,128], index: 0, kind: input, shape index: {}]   ;;  %s198_s1 = inlined_call_operand.hbm [shape: f32[8,128], index: 1, kind: input, shape index: {}]   ;;  %s199_s2 = inlined_call_operand.vmem [shape: f32[1,128], index: 2, kind: input, shape index: {}]   ;;  %s200_s3 = inlined_call_operand.hbm [shape: f32[8,128], index: 3, kind: output, shape index: {}]  }
   0x1   :  { %9 = vsyncpa [#allocation6], 0 }
   0x2   :  { %10 = vsyncpa [#allocation4], 0  ;;  %s16_s14 = sshll.u32 %s197_s0, 4  ;;  %s161_s15 = smov [#allocation2]   ;;  %s17_s14 = int_to_ptr.hbm [resolvable:$true] %s16_s14 }
   0x3   :  { %s18_s16 = sshll.u32 %s161_s15, 4  ;;  %s27_s19 = sshll.u32 %s198_s1, 4  ;;  %s19_s16 = int_to_ptr.vmem [resolvable:$true] %s18_s16  ;;  %s28_s19 = int_to_ptr.hbm [resolvable:$true] %s27_s19 }
   0x4   :  { %21 = dma.hbm_to_vmem [thread:$0]  %s17_s14, 16, %s19_s16, [#allocation3]  }
   0x5   :  { %s162_s20 = smov [#allocation5]  }
   0x6   :  { %s29_s21 = sshll.u32 %s162_s20, 4  ;;  %s30_s21 = int_to_ptr.vmem [resolvable:$true] %s29_s21 }
   0x7   :  { %32 = dma.hbm_to_vmem [thread:$0]  %s28_s19, 128, %s30_s21, [#allocation6]  }
   0x8   :  { %155 = dma.done.wait [#allocation3], 16  }
   0x9   :  { %156 = vsyncadd [#allocation3], 4294967280 }
   0xa   :  { %157 = dma.done.wait [#allocation6], 128  }
   0xb   :  { %158 = vsyncadd [#allocation6], 4294967168  ;;  %v45_v0 = vld [vmem:[#allocation2] sm:$0x1]  ;;  %v163_v1 = vmov 0   ;;  %s164_s1 = smov [#allocation7]  }
   0xc   :  { %vm46_vm0 = vnez %v45_v0  ;;  %v82_v5 = vld [vmem:[%s199_s2] ss:$0 sm:$0xff]  ;;  %s65_s23 = sshll.u32 %s164_s1, 4  ;;  %s67_s26 = sshll.u32 %s200_s3, 4  ;;  %v47_v6 = vld [vmem:[#allocation5] sm:$0xff]  ;;  %s66_s23 = int_to_ptr.vmem [resolvable:$true] %s65_s23  ;;  %s68_s26 = int_to_ptr.hbm [resolvable:$true] %s67_s26 }
   0xd   :  { %v49_v2 = vsel %vm46_vm0, 16843009, %v163_v1 }
   0xe   :  { %v50_v3 = vunpack.c.0.s8 %v49_v2 }
  0x10   :  { %vm51_vm1 = vcmp.ne.s32.totalorder %v50_v3, 0 }
  0x11   :  { %v52_v4 = vsel %vm51_vm1, 1, %v163_v1 }
  0x12   :  { %v53_v7 = vperm.slane %v52_v4, 0 }
  0x14   :  { %vm54_vm2 = vcmp.eq.s32.totalorder %v53_v7, 1 }
  0x15   :  { %v58_v8 = vsel %vm54_vm2, %v47_v6, %v82_v5 }
  0x16   :  { %59 = vst [vmem:[#allocation7] sm:$0xff] %v58_v8 }
  0x17   :  { %70 = dma.vmem_to_hbm [thread:$0]  %s66_s23, 128, %s68_s26, [#allocation4]  }
  0x18   :  { %159 = dma.done.wait [#allocation4], 128  }
  0x19   :  { %160 = vsyncadd [#allocation4], 4294967168 }
  0x1a   :  { %75 = vsyncpa [#allocation3], 1 }
  0x1b   :  { %76 = vsyncpa [#allocation6], 1 }
  0x1c   :  { %77 = vsyncpa [#allocation4], 1 }

</bundles_post_ra>
